<compile_context>
chip_gen: v7x
topology: tpu7x:2x2x1
jax: 0.10.0
libtpu: 0.0.40
codegen_flags: <defaults>
</compile_context>

<pallas_src>
import functools

import numpy as np

import jax
import jax.numpy as jnp
from jax import lax
from jax.experimental import pallas as pl
from jax.experimental.pallas import tpu as pltpu


def _div_mod_const(v, d):
    """Integer div/mod of an int32 array by a positive Python constant.

    Uses shift/mask for powers of two (cheap VPU bit ops); falls back to //, %.
    """
    if d & (d - 1) == 0:
        shift = d.bit_length() - 1
        return v >> shift, v & (d - 1)
    return v // d, v % d


def _max_unpool_kernel(*refs, temporal, T_p, W_p, W_out, HWp, HWout):
    if temporal:
        s_ref, x_ref, it_ref, is_ref, o_ref = refs
        n_rt = 2
    else:
        s_ref, x_ref, is_ref, o_ref = refs
        n_rt = 1

    x = x_ref[0]            # (Mi, HWp)        rows = (c, tp), native dtype
    isf = is_ref[0]         # (Mi, n_rt*HWp)   lanes = (rt, h, w), int32
    S = s_ref[...]          # (4*HWp, HWout)   constant 0/1 scatter matrix
    zero = jnp.zeros((), x.dtype)

    # Source coordinates of each pooled cell, from the lane index.
    hw = lax.broadcasted_iota(jnp.int32, x.shape, 1)
    h_src, w_src = _div_mod_const(hw, W_p)

    if temporal:
        it = it_ref[0]      # (Mi, HWp) int32 indices into T_out
        # fused row m = c*T_p + tp  ->  tp = m % T_p
        m = lax.broadcasted_iota(jnp.int32, x.shape, 0)
        _, tp = _div_mod_const(m, T_p)
        t_base = 2 * tp

    ys = []
    for rt in range(n_rt):
        # Spatial indices of temporal output slot t_out = 2*tp + rt.
        is_rt = isf[:, rt * HWp:(rt + 1) * HWp]
        row, col = _div_mod_const(is_rt, W_out)
        bh = row - 2 * h_src            # in {0, 1} for valid indices
        bw = col - 2 * w_src
        base = (it == t_base + rt) if temporal else None

        # 4 window-local masked copies, concatenated along the contraction
        # axis -> single full-depth (K = 4*HWp) MXU pass.
        zs = []
        for (p, q) in ((0, 0), (0, 1), (1, 0), (1, 1)):
            mask = (bh == p) & (bw == q)
            if base is not None:
                mask = mask & base
            zs.append(jnp.where(mask, x, zero))
        z = jnp.concatenate(zs, axis=1)                      # (Mi, 4*HWp)
        ys.append(jnp.dot(z, S, preferred_element_type=jnp.float32))

    y = ys[0] if n_rt == 1 else jnp.concatenate(ys, axis=1)  # (Mi, n_rt*HWout)
    o_ref[0] = y.astype(o_ref.dtype)                         # one wide store


def _pick_channel_block(C, T_p, per_c_bytes, const_bytes, n_batch, budget):
    """Largest channel block whose double-buffered working set fits `budget`,
    satisfies the (8, 128) row constraint, and (preferably) yields an even
    number of grid steps so both v7x TensorCores get work."""
    divs = [d for d in range(1, C + 1) if C % d == 0]
    # Fused row dim Cb*T_p must be a multiple of 8, or equal the full dim
    # (Cb == C) so the BlockSpec covers the whole array.
    valid = [d for d in divs if (d * T_p) % 8 == 0 or d == C]
    within = [d for d in valid
              if 2 * d * per_c_bytes + 2 * const_bytes <= budget] or [min(valid)]
    even = [d for d in within if (n_batch * (C // d)) % 2 == 0]
    return max(even) if even else max(within)


def max_unpool(x, inds_temporal, inds_spatial, siz, *, temporal=True):
    """Pallas equivalent of _MaxUnpool(X=2, T=2, kernels=strides=2).forward."""
    N, C, T_p, H_p, W_p = x.shape
    _, _, T_out, H_out, W_out = siz
    HWp = H_p * W_p
    HWout = H_out * W_out
    assert H_out == 2 * H_p and W_out == 2 * W_p, "spatial kernel=stride=2 only"
    if temporal:
        assert T_out == 2 * T_p, "temporal kernel=stride=2 only"
        n_rt = 2
    else:
        # TODO(synk): temporal=False is a pure pass-through on the T axis
        # (matches the module, which skips the temporal unpool in that config).
        assert T_p == T_out, "temporal=False requires T_p == T_out"
        n_rt = 1
    assert inds_spatial.shape == (N, C, T_out, H_p, W_p)

    out_dtype = x.dtype
    # Pure selection => bf16 is bit-exact for bf16 inputs; avoid f32 upcast.
    mat_dtype = jnp.bfloat16 if out_dtype == jnp.bfloat16 else jnp.float32

    # Free metadata reshapes: fuse (C, T_p) into the sublane row axis; fold the
    # temporal output slot rt (t_out = 2*tp + rt) and (H, W) into lanes.
    x2 = x.reshape(N, C * T_p, HWp)
    if x2.dtype != mat_dtype:
        x2 = x2.astype(mat_dtype)
    is2 = inds_spatial.reshape(N, C * T_p, n_rt * HWp).astype(jnp.int32)

    # Constant 0/1 scatter matrix for the combined K = 4*HWp dot: contraction
    # lane k*HWp + hw (k = 2p + q) lands on output cell (2h+p)*W_out + (2w+q).
    hw = np.arange(HWp)
    h, w = hw // W_p, hw % W_p
    S_np = np.zeros((4 * HWp, HWout), np.float32)
    for k, (p, q) in enumerate(((0, 0), (0, 1), (1, 0), (1, 1))):
        S_np[k * HWp + hw, (2 * h + p) * W_out + (2 * w + q)] = 1.0
    S = jnp.asarray(S_np, dtype=mat_dtype)
    # TODO(synk): if HWp << 128 in real workloads, fuse a factor of T_p into the
    # input lane axis (block-diagonal S) for fully lane-dense input vregs.

    mat_item = jnp.dtype(mat_dtype).itemsize
    out_item = jnp.dtype(out_dtype).itemsize
    per_c_bytes = (T_p * HWp * mat_item                       # x block
                   + (T_p * HWp * 4 if temporal else 0)       # it block
                   + T_p * n_rt * HWp * 4                     # is block
                   + T_p * n_rt * HWout * out_item)           # out block
    const_bytes = 4 * HWp * HWout * mat_item                  # S

    try:
        vmem_cap = pltpu.get_tpu_info().vmem_capacity_bytes
    except Exception:  # pragma: no cover - hw-info query unavailable
        vmem_cap = 128 << 20
    budget = min(16 << 20, vmem_cap // 8)   # ~16 MiB on 128-MiB chips, 8 on v7x

    Cb = _pick_channel_block(C, T_p, per_c_bytes, const_bytes, N, budget)
    Mi = Cb * T_p
    grid = (N, C // Cb)

    # Honest VMEM limit: constants + double-buffered per-step blocks, 2x slack.
    vmem_need = 2 * const_bytes + 2 * Cb * per_c_bytes
    vmem_limit = int(min(32 << 20, max(8 << 20, 2 * vmem_need)))

    kernel = functools.partial(_max_unpool_kernel, temporal=temporal,
                               T_p=T_p, W_p=W_p, W_out=W_out,
                               HWp=HWp, HWout=HWout)

    if temporal:
        it2 = inds_temporal.reshape(N, C * T_p, HWp).astype(jnp.int32)
        inputs = (S, x2, it2, is2)
        in_specs = [
            pl.BlockSpec((4 * HWp, HWout), lambda n, c: (0, 0)),
            pl.BlockSpec((1, Mi, HWp), lambda n, c: (n, c, 0)),
            pl.BlockSpec((1, Mi, HWp), lambda n, c: (n, c, 0)),
            pl.BlockSpec((1, Mi, n_rt * HWp), lambda n, c: (n, c, 0)),
        ]
    else:
        inputs = (S, x2, is2)
        in_specs = [
            pl.BlockSpec((4 * HWp, HWout), lambda n, c: (0, 0)),
            pl.BlockSpec((1, Mi, HWp), lambda n, c: (n, c, 0)),
            pl.BlockSpec((1, Mi, n_rt * HWp), lambda n, c: (n, c, 0)),
        ]

    out2 = pl.pallas_call(
        kernel,
        out_shape=jax.ShapeDtypeStruct((N, C * T_p, n_rt * HWout), out_dtype),
        grid=grid,
        in_specs=in_specs,
        out_specs=pl.BlockSpec((1, Mi, n_rt * HWout), lambda n, c: (n, c, 0)),
        compiler_params=pltpu.CompilerParams(
            dimension_semantics=("parallel", "parallel"),
            vmem_limit_bytes=vmem_limit),
    )(*inputs)
    # Rows (c, tp) x lanes (rt, ho, wo) -> (N, C, T_out=2*tp+rt, H_out, W_out),
    # a free reshape because t_out = 2*tp + rt is exactly the fused ordering.
    return out2.reshape(N, C, T_out, H_out, W_out)


def _reference(x, inds_t, inds_s, siz):
    """Pure-JAX scatter reference reproducing the PyTorch semantics."""
    N, C, T_p, H_p, W_p = x.shape
    _, _, T_out, H_out, W_out = siz
    n_i, c_i, _, h_i, w_i = jnp.meshgrid(
        jnp.arange(N), jnp.arange(C), jnp.arange(T_p),
        jnp.arange(H_p), jnp.arange(W_p), indexing="ij")
    y = jnp.zeros((N, C, T_out, H_p, W_p), x.dtype)
    y = y.at[n_i, c_i, inds_t, h_i, w_i].set(x)

    n2, c2, t2, _, _ = jnp.meshgrid(
        jnp.arange(N), jnp.arange(C), jnp.arange(T_out),
        jnp.arange(H_p), jnp.arange(W_p), indexing="ij")
    z = jnp.zeros((N, C, T_out, H_out * W_out), x.dtype)
    z = z.at[n2, c2, t2, inds_s].set(y)
    return z.reshape(N, C, T_out, H_out, W_out)


if __name__ == "__main__":
    # Small shapes consistent with the module (X=2 spatial dims, time at dim T=2).
    N, C, T_p, H_p, W_p = 2, 4, 4, 8, 8
    T_out, H_out, W_out = 2 * T_p, 2 * H_p, 2 * W_p   # kernel=stride=2 unpool
    siz = (N, C, T_out, H_out, W_out)

    key = jax.random.PRNGKey(0)
    kx, kt, kh, kw = jax.random.split(key, 4)
    x = jax.random.normal(kx, (N, C, T_p, H_p, W_p), dtype=jnp.float32)

    # Valid MaxUnpool1d indices: pooled slot t maps to output slot 2*t or 2*t+1.
    bt = jax.random.randint(kt, (N, C, T_p, H_p, W_p), 0, 2)
    inds_temporal = (2 * jnp.arange(T_p)[None, None, :, None, None] + bt).astype(jnp.int32)

    # Valid MaxUnpool2d flat indices into H_out*W_out (within each 2x2 window).
    bh = jax.random.randint(kh, (N, C, T_out, H_p, W_p), 0, 2)
    bw = jax.random.randint(kw, (N, C, T_out, H_p, W_p), 0, 2)
    h_idx = 2 * jnp.arange(H_p)[None, None, None, :, None] + bh
    w_idx = 2 * jnp.arange(W_p)[None, None, None, None, :] + bw
    inds_spatial = (h_idx * W_out + w_idx).astype(jnp.int32)

    out = max_unpool(x, inds_temporal, inds_spatial, siz, temporal=True)
    out = jax.block_until_ready(out)

    ref = _reference(x, inds_temporal, inds_spatial, siz)
    assert out.shape == siz, out.shape
    assert jnp.allclose(out, ref, atol=1e-5, rtol=1e-5), float(jnp.max(jnp.abs(out - ref)))
    print("KERNEL_OK")
</pallas_src>

<mosaic_0001>
module attributes {stable_mosaic.version = 11 : i64} {
  func.func @_max_unpool_kernel(%arg0: i32, %arg1: i32, %arg2: memref<256x256xf32, #tpu.memory_space<vmem>>, %arg3: memref<1x16x64xf32, #tpu.memory_space<vmem>>, %arg4: memref<1x16x64xi32, #tpu.memory_space<vmem>>, %arg5: memref<1x16x128xi32, #tpu.memory_space<vmem>>, %arg6: memref<1x16x512xf32, #tpu.memory_space<vmem>>) attributes {dimension_semantics = [#tpu.dimension_semantics<parallel>, #tpu.dimension_semantics<parallel>], iteration_bounds = array<i64: 2, 1>, scalar_prefetch = 0 : i64, scratch_operands = 0 : i64, tpu.core_type = #tpu.core_type<tc>, window_params = [{pipeline_mode = #tpu.pipeline_mode<synchronous>, transform_indices = @transform_0, window_bounds = array<i64: 256, 256>}, {transform_indices = @transform_1, window_bounds = array<i64: 1, 16, 64>}, {transform_indices = @transform_2, window_bounds = array<i64: 1, 16, 64>}, {transform_indices = @transform_3, window_bounds = array<i64: 1, 16, 128>}, {transform_indices = @transform_4, window_bounds = array<i64: 1, 16, 512>}]} {
    %c0 = arith.constant 0 : index
    %c0_0 = arith.constant 0 : index
    %c0_1 = arith.constant 0 : index
    %0 = vector.load %arg3[%c0, %c0_0, %c0_1] : memref<1x16x64xf32, #tpu.memory_space<vmem>>, vector<1x16x64xf32>
    %1 = vector.shape_cast %0 : vector<1x16x64xf32> to vector<16x64xf32>
    %c0_2 = arith.constant 0 : index
    %c0_3 = arith.constant 0 : index
    %c0_4 = arith.constant 0 : index
    %2 = vector.load %arg5[%c0_2, %c0_3, %c0_4] : memref<1x16x128xi32, #tpu.memory_space<vmem>>, vector<1x16x128xi32>
    %3 = vector.shape_cast %2 : vector<1x16x128xi32> to vector<16x128xi32>
    %c0_5 = arith.constant 0 : index
    %c0_6 = arith.constant 0 : index
    %4 = vector.load %arg2[%c0_5, %c0_6] : memref<256x256xf32, #tpu.memory_space<vmem>>, vector<256x256xf32>
    %5 = tpu.iota {dimensions = array<i32: 1>} : vector<16x64xi32>
    %c3_i32 = arith.constant 3 : i32
    %6 = vector.broadcast %c3_i32 : i32 to vector<16x64xi32>
    %7 = arith.shrsi %5, %6 : vector<16x64xi32>
    %c7_i32 = arith.constant 7 : i32
    %8 = vector.broadcast %c7_i32 : i32 to vector<16x64xi32>
    %9 = arith.andi %5, %8 : vector<16x64xi32>
    %c0_7 = arith.constant 0 : index
    %c0_8 = arith.constant 0 : index
    %c0_9 = arith.constant 0 : index
    %10 = vector.load %arg4[%c0_7, %c0_8, %c0_9] : memref<1x16x64xi32, #tpu.memory_space<vmem>>, vector<1x16x64xi32>
    %11 = vector.shape_cast %10 : vector<1x16x64xi32> to vector<16x64xi32>
    %12 = tpu.iota {dimensions = array<i32: 0>} : vector<16x64xi32>
    %c3_i32_10 = arith.constant 3 : i32
    %13 = vector.broadcast %c3_i32_10 : i32 to vector<16x64xi32>
    %14 = arith.andi %12, %13 : vector<16x64xi32>
    %c2_i32 = arith.constant 2 : i32
    %15 = vector.broadcast %c2_i32 : i32 to vector<16x64xi32>
    %16 = arith.muli %15, %14 : vector<16x64xi32>
    %17 = vector.extract_strided_slice %3 {offsets = [0, 0], sizes = [16, 64], strides = [1, 1]} : vector<16x128xi32> to vector<16x64xi32>
    %c4_i32 = arith.constant 4 : i32
    %18 = vector.broadcast %c4_i32 : i32 to vector<16x64xi32>
    %19 = arith.shrsi %17, %18 : vector<16x64xi32>
    %c15_i32 = arith.constant 15 : i32
    %20 = vector.broadcast %c15_i32 : i32 to vector<16x64xi32>
    %21 = arith.andi %17, %20 : vector<16x64xi32>
    %c2_i32_11 = arith.constant 2 : i32
    %22 = vector.broadcast %c2_i32_11 : i32 to vector<16x64xi32>
    %23 = arith.muli %22, %7 : vector<16x64xi32>
    %24 = arith.subi %19, %23 : vector<16x64xi32>
    %c2_i32_12 = arith.constant 2 : i32
    %25 = vector.broadcast %c2_i32_12 : i32 to vector<16x64xi32>
    %26 = arith.muli %25, %9 : vector<16x64xi32>
    %27 = arith.subi %21, %26 : vector<16x64xi32>
    %c0_i32 = arith.constant 0 : i32
    %28 = vector.broadcast %c0_i32 : i32 to vector<16x64xi32>
    %29 = arith.addi %16, %28 : vector<16x64xi32>
    %30 = arith.cmpi eq, %11, %29 : vector<16x64xi32>
    %c0_i32_13 = arith.constant 0 : i32
    %31 = vector.broadcast %c0_i32_13 : i32 to vector<16x64xi32>
    %32 = arith.cmpi eq, %24, %31 : vector<16x64xi32>
    %c0_i32_14 = arith.constant 0 : i32
    %33 = vector.broadcast %c0_i32_14 : i32 to vector<16x64xi32>
    %34 = arith.cmpi eq, %27, %33 : vector<16x64xi32>
    %35 = arith.andi %32, %34 : vector<16x64xi1>
    %36 = arith.andi %35, %30 : vector<16x64xi1>
    %cst = arith.constant 0.000000e+00 : f32
    %37 = vector.broadcast %cst : f32 to vector<16x64xf32>
    %38 = arith.select %36, %1, %37 : vector<16x64xi1>, vector<16x64xf32>
    %c0_i32_15 = arith.constant 0 : i32
    %39 = vector.broadcast %c0_i32_15 : i32 to vector<16x64xi32>
    %40 = arith.cmpi eq, %24, %39 : vector<16x64xi32>
    %c1_i32 = arith.constant 1 : i32
    %41 = vector.broadcast %c1_i32 : i32 to vector<16x64xi32>
    %42 = arith.cmpi eq, %27, %41 : vector<16x64xi32>
    %43 = arith.andi %40, %42 : vector<16x64xi1>
    %44 = arith.andi %43, %30 : vector<16x64xi1>
    %cst_16 = arith.constant 0.000000e+00 : f32
    %45 = vector.broadcast %cst_16 : f32 to vector<16x64xf32>
    %46 = arith.select %44, %1, %45 : vector<16x64xi1>, vector<16x64xf32>
    %c1_i32_17 = arith.constant 1 : i32
    %47 = vector.broadcast %c1_i32_17 : i32 to vector<16x64xi32>
    %48 = arith.cmpi eq, %24, %47 : vector<16x64xi32>
    %c0_i32_18 = arith.constant 0 : i32
    %49 = vector.broadcast %c0_i32_18 : i32 to vector<16x64xi32>
    %50 = arith.cmpi eq, %27, %49 : vector<16x64xi32>
    %51 = arith.andi %48, %50 : vector<16x64xi1>
    %52 = arith.andi %51, %30 : vector<16x64xi1>
    %cst_19 = arith.constant 0.000000e+00 : f32
    %53 = vector.broadcast %cst_19 : f32 to vector<16x64xf32>
    %54 = arith.select %52, %1, %53 : vector<16x64xi1>, vector<16x64xf32>
    %c1_i32_20 = arith.constant 1 : i32
    %55 = vector.broadcast %c1_i32_20 : i32 to vector<16x64xi32>
    %56 = arith.cmpi eq, %24, %55 : vector<16x64xi32>
    %c1_i32_21 = arith.constant 1 : i32
    %57 = vector.broadcast %c1_i32_21 : i32 to vector<16x64xi32>
    %58 = arith.cmpi eq, %27, %57 : vector<16x64xi32>
    %59 = arith.andi %56, %58 : vector<16x64xi1>
    %60 = arith.andi %59, %30 : vector<16x64xi1>
    %cst_22 = arith.constant 0.000000e+00 : f32
    %61 = vector.broadcast %cst_22 : f32 to vector<16x64xf32>
    %62 = arith.select %60, %1, %61 : vector<16x64xi1>, vector<16x64xf32>
    %63 = tpu.concatenate %38, %46, %54, %62 in 1 : vector<16x64xf32>, vector<16x64xf32>, vector<16x64xf32>, vector<16x64xf32> -> vector<16x256xf32>
    %cst_23 = arith.constant dense<0.000000e+00> : vector<16x256xf32>
    %64 = tpu.matmul %63, %4, %cst_23 {dimension_numbers = #tpu.dot_dimension_numbers<[1], [0], [0], [1], [0, 0, 1, 1], [], []>} : vector<16x256xf32>, vector<256x256xf32>, vector<16x256xf32> -> vector<16x256xf32>
    %65 = vector.extract_strided_slice %3 {offsets = [0, 64], sizes = [16, 64], strides = [1, 1]} : vector<16x128xi32> to vector<16x64xi32>
    %c4_i32_24 = arith.constant 4 : i32
    %66 = vector.broadcast %c4_i32_24 : i32 to vector<16x64xi32>
    %67 = arith.shrsi %65, %66 : vector<16x64xi32>
    %c15_i32_25 = arith.constant 15 : i32
    %68 = vector.broadcast %c15_i32_25 : i32 to vector<16x64xi32>
    %69 = arith.andi %65, %68 : vector<16x64xi32>
    %c2_i32_26 = arith.constant 2 : i32
    %70 = vector.broadcast %c2_i32_26 : i32 to vector<16x64xi32>
    %71 = arith.muli %70, %7 : vector<16x64xi32>
    %72 = arith.subi %67, %71 : vector<16x64xi32>
    %c2_i32_27 = arith.constant 2 : i32
    %73 = vector.broadcast %c2_i32_27 : i32 to vector<16x64xi32>
    %74 = arith.muli %73, %9 : vector<16x64xi32>
    %75 = arith.subi %69, %74 : vector<16x64xi32>
    %c1_i32_28 = arith.constant 1 : i32
    %76 = vector.broadcast %c1_i32_28 : i32 to vector<16x64xi32>
    %77 = arith.addi %16, %76 : vector<16x64xi32>
    %78 = arith.cmpi eq, %11, %77 : vector<16x64xi32>
    %c0_i32_29 = arith.constant 0 : i32
    %79 = vector.broadcast %c0_i32_29 : i32 to vector<16x64xi32>
    %80 = arith.cmpi eq, %72, %79 : vector<16x64xi32>
    %c0_i32_30 = arith.constant 0 : i32
    %81 = vector.broadcast %c0_i32_30 : i32 to vector<16x64xi32>
    %82 = arith.cmpi eq, %75, %81 : vector<16x64xi32>
    %83 = arith.andi %80, %82 : vector<16x64xi1>
    %84 = arith.andi %83, %78 : vector<16x64xi1>
    %cst_31 = arith.constant 0.000000e+00 : f32
    %85 = vector.broadcast %cst_31 : f32 to vector<16x64xf32>
    %86 = arith.select %84, %1, %85 : vector<16x64xi1>, vector<16x64xf32>
    %c0_i32_32 = arith.constant 0 : i32
    %87 = vector.broadcast %c0_i32_32 : i32 to vector<16x64xi32>
    %88 = arith.cmpi eq, %72, %87 : vector<16x64xi32>
    %c1_i32_33 = arith.constant 1 : i32
    %89 = vector.broadcast %c1_i32_33 : i32 to vector<16x64xi32>
    %90 = arith.cmpi eq, %75, %89 : vector<16x64xi32>
    %91 = arith.andi %88, %90 : vector<16x64xi1>
    %92 = arith.andi %91, %78 : vector<16x64xi1>
    %cst_34 = arith.constant 0.000000e+00 : f32
    %93 = vector.broadcast %cst_34 : f32 to vector<16x64xf32>
    %94 = arith.select %92, %1, %93 : vector<16x64xi1>, vector<16x64xf32>
    %c1_i32_35 = arith.constant 1 : i32
    %95 = vector.broadcast %c1_i32_35 : i32 to vector<16x64xi32>
    %96 = arith.cmpi eq, %72, %95 : vector<16x64xi32>
    %c0_i32_36 = arith.constant 0 : i32
    %97 = vector.broadcast %c0_i32_36 : i32 to vector<16x64xi32>
    %98 = arith.cmpi eq, %75, %97 : vector<16x64xi32>
    %99 = arith.andi %96, %98 : vector<16x64xi1>
    %100 = arith.andi %99, %78 : vector<16x64xi1>
    %cst_37 = arith.constant 0.000000e+00 : f32
    %101 = vector.broadcast %cst_37 : f32 to vector<16x64xf32>
    %102 = arith.select %100, %1, %101 : vector<16x64xi1>, vector<16x64xf32>
    %c1_i32_38 = arith.constant 1 : i32
    %103 = vector.broadcast %c1_i32_38 : i32 to vector<16x64xi32>
    %104 = arith.cmpi eq, %72, %103 : vector<16x64xi32>
    %c1_i32_39 = arith.constant 1 : i32
    %105 = vector.broadcast %c1_i32_39 : i32 to vector<16x64xi32>
    %106 = arith.cmpi eq, %75, %105 : vector<16x64xi32>
    %107 = arith.andi %104, %106 : vector<16x64xi1>
    %108 = arith.andi %107, %78 : vector<16x64xi1>
    %cst_40 = arith.constant 0.000000e+00 : f32
    %109 = vector.broadcast %cst_40 : f32 to vector<16x64xf32>
    %110 = arith.select %108, %1, %109 : vector<16x64xi1>, vector<16x64xf32>
    %111 = tpu.concatenate %86, %94, %102, %110 in 1 : vector<16x64xf32>, vector<16x64xf32>, vector<16x64xf32>, vector<16x64xf32> -> vector<16x256xf32>
    %cst_41 = arith.constant dense<0.000000e+00> : vector<16x256xf32>
    %112 = tpu.matmul %111, %4, %cst_41 {dimension_numbers = #tpu.dot_dimension_numbers<[1], [0], [0], [1], [0, 0, 1, 1], [], []>} : vector<16x256xf32>, vector<256x256xf32>, vector<16x256xf32> -> vector<16x256xf32>
    %113 = tpu.concatenate %64, %112 in 1 : vector<16x256xf32>, vector<16x256xf32> -> vector<16x512xf32>
    %c0_42 = arith.constant 0 : index
    %c0_43 = arith.constant 0 : index
    %c0_44 = arith.constant 0 : index
    %114 = vector.load %arg6[%c0_42, %c0_43, %c0_44] : memref<1x16x512xf32, #tpu.memory_space<vmem>>, vector<1x16x512xf32>
    %115 = vector.shape_cast %114 : vector<1x16x512xf32> to vector<16x512xf32>
    %116 = vector.shape_cast %113 : vector<16x512xf32> to vector<1x16x512xf32>
    tpu.vector_store %arg6[%c0_42, %c0_43, %c0_44], %116 {strides = array<i32>} : memref<1x16x512xf32, #tpu.memory_space<vmem>>, vector<1x16x512xf32>,
    return
  }
  func.func @transform_0(%arg0: i32, %arg1: i32) -> (i32, i32) {
    %c0_i32 = arith.constant 0 : i32
    %c0_i32_0 = arith.constant 0 : i32
    %c0_i32_1 = arith.constant 0 : i32
    return %c0_i32, %c0_i32_0 : i32, i32
  }
  func.func @transform_1(%arg0: i32, %arg1: i32) -> (i32, i32, i32) {
    %c0_i32 = arith.constant 0 : i32
    %c0_i32_0 = arith.constant 0 : i32
    return %arg0, %arg1, %c0_i32 : i32, i32, i32
  }
  func.func @transform_2(%arg0: i32, %arg1: i32) -> (i32, i32, i32) {
    %c0_i32 = arith.constant 0 : i32
    %c0_i32_0 = arith.constant 0 : i32
    return %arg0, %arg1, %c0_i32 : i32, i32, i32
  }
  func.func @transform_3(%arg0: i32, %arg1: i32) -> (i32, i32, i32) {
    %c0_i32 = arith.constant 0 : i32
    %c0_i32_0 = arith.constant 0 : i32
    return %arg0, %arg1, %c0_i32 : i32, i32, i32
  }
  func.func @transform_4(%arg0: i32, %arg1: i32) -> (i32, i32, i32) {
    %c0_i32 = arith.constant 0 : i32
    %c0_i32_0 = arith.constant 0 : i32
    return %arg0, %arg1, %c0_i32 : i32, i32, i32
  }
}

</mosaic_0001>

<bundles_post_ra>
// kernel: tpu_custom_call.1
= control target key start
LH: loop header
LB: loop body
LE: loop exit
PB: predicated region body
PF: predicated region fallthrough
CT: control target
= control target key end

     0   :  { %s1994_s0 = inlined_call_operand.hbm [shape: f32[256,256], index: 0, kind: input, shape index: {}]   ;;  %s1995_s1 = inlined_call_operand.hbm [shape: f32[2,16,64], index: 1, kind: input, shape index: {}]   ;;  %s1996_s2 = inlined_call_operand.hbm [shape: s32[2,16,64], index: 2, kind: input, shape index: {}]   ;;  %s1997_s3 = inlined_call_operand.hbm [shape: s32[2,16,128], index: 3, kind: input, shape index: {}]   ;;  %s1998_s4 = inlined_call_operand.hbm [shape: f32[2,16,512], index: 4, kind: output, shape index: {}]  }
   0x1   :  { %2026 = sst [smem:[#allocation20_spill]] %s1995_s1 }
   0x2   :  { %9 = vsyncpa [#allocation3], 0 }
   0x3   :  { %10 = vsyncpa [#allocation6], 0 }
   0x4   :  { %12 = vsyncpa [#allocation6 + $0x1], 0 }
   0x5   :  { %13 = vsyncpa [#allocation9], 0 }
   0x6   :  { %15 = vsyncpa [#allocation9 + $0x1], 0 }
   0x7   :  { %16 = vsyncpa [#allocation4], 0 }
   0x8   :  { %18 = vsyncpa [#allocation4 + $0x1], 0  ;;  %s1407_s15 = smov 0   ;;  %s1409_s16 = smov 0  }
   0x9   :  { %s1411_s17 = smov 0   ;;  %s1413_s18 = smov 0  }
   0xa   :  { %s1415_s19 = smov 0   ;;  %s1417_s20 = smov 0  }
   0xb LB: > { %2027 = sst [smem:[#allocation15_spill]] %s1363_s19  ;;  %s36_s21 = sadd.s32 1, %s1363_s19  ;;  %s1367_s20 = sphi %s1417_s20, %s24_s20   ;;  %s1363_s19 = sphi %s1415_s19, %s2104_s19   ;;  %s1359_s18 = sphi %s1413_s18, %s2103_s18   ;;  %s1355_s17 = sphi %s1411_s17, %s2107_s17   ;;  %s1351_s16 = sphi %s1409_s16, %s2106_s16   ;;  %s1347_s15 = sphi %s1407_s15, %s2105_s15  }
   0xc   : > { %2028 = sst [smem:[#allocation16_spill]] %s1367_s20  ;;  %s66_s22 = sadd.s32 1, %s1355_s17 }
   0xd   : > { %p38_p0 = scmp.ge.s32.totalorder %s36_s21, 2  ;;  %p1999_p1 = scmp.ne.s32.totalorder %s1355_s17, %s1351_s16 }
   0xe   : > { %p74_p2 = scmp.eq.s32.totalorder %s1367_s20, 0  ;;  %p1079_p5 = scmp.lt.s32.totalorder %s1367_s20, 2 }
   0xf   : > { %s2109_s21 = smov (%p38_p0, %s36_s21), 0  ;;  %s200_s24 = sand.u32 1, %s1367_s20  }
  0x10   : > { %2029 = sst [smem:[#allocation17_spill]] %s2109_s21  ;;  %p75_p4 = por %p74_p2, %p1999_p1 }
  0x11   : > { %s61_s23 = ssub.s32 %s1363_s19, %s2109_s21  ;;  %s2000_s25 = sand.u32 1, %s1355_s17  }
  0x12   : > { %p64_p6 = scmp.eq.s32.totalorder %s61_s23, 0  ;;  %s1454_s26 = sshll.u32 %s1363_s19, 8 }
  0x13   : > { %s1461_s28 = sshll.u32 %s2000_s25, 4  ;;  %s2031_s1 = sld [smem:[#allocation20_spill]] }
  0x14   : > { %s1457_s27 = scalar_select %p64_p6, %s1355_s17, %s66_s22  }
  0x15   : > { %p1469_p7 = pnand %p1079_p5, %p75_p4  ;;  %s204_s7 = scalar_lea.vmem [#allocation5], %s1461_s28 }
  0x16   : > { %2030 = sst [smem:[#allocation18_spill]] %s1457_s27  ;;  %s213_s8 = sshll.u32 %s204_s7, 4  ;;  %s1474_s8 = int_to_ptr.vmem [resolvable:$true] %s213_s8 }
  0x17   : > { %s2032_s6 = scalar_select %p1469_p7, 1, 0 }
  0x18   : > { %s1476_s9 = scalar_lea.sflag [#allocation6], %s200_s24  ;;  %p1482_p9 = pneg %p1469_p7 }
  0x19   : > { %s1467_s5 = scalar_lea.hbm %s2031_s1, %s1454_s26  ;;  %s1164_s14 = scalar_lea.hbm %s2031_s1, 512 }
  0x1a   : > { %s1159_s10 = scalar_lea.hbm %s1467_s5, 256  ;;  %p1165_p12 = scmp.lt.u32.totalorder %s1467_s5, %s2031_s1 }
  0x1b   : > { %p1160_p8 = scmp.ne.s32.totalorder %s1467_s5, %s1159_s10  ;;  %p1166_p13 = scmp.lt.u32.totalorder %s1164_s14, %s1159_s10 }
  0x1c   : > { %s2033_s11 = scalar_select %p1482_p9, 1, 0 }
  0x1d   : > { %p1162_p10 = pnand %p1482_p9, %p1160_p8  ;;  %p1167_p0 = por %p1166_p13, %p1165_p12 }
  0x1e   : > { %p1168_p2 = scmp.lt.u32.totalorder %s1159_s10, %s1467_s5 }
  0x1f   : > { %p1163_p11 = pneg %p1162_p10 }
  0x20   : > { %p1169_p4 = por %p1168_p2, %p1167_p0 }
  0x22   : > { %p1170_p5 = pnand %p1169_p4, %p1163_p11 }
  0x24   : > { %1173 = shalt.err (!%p1170_p5)
}
  0x25   : > { %s1174_s24 = scalar_lea.vmem %s1474_s8, 256  ;;  %s1369_s29 = smov [#allocation5]  }
  0x26   : > { %p1175_p6 = scmp.ne.s32.totalorder %s1474_s8, %s1174_s24  ;;  %s1179_s30 = sshll.u32 %s1369_s29, 4  ;;  %s1180_s30 = int_to_ptr.vmem [resolvable:$false] %s1179_s30 }
  0x27   : > { %s1181_s7 = scalar_lea.vmem %s1180_s30, 512  ;;  %p1182_p3 = scmp.lt.s32.totalorder %s1474_s8, %s1180_s30 }
  0x28   : > { %p1177_p8 = pnand %p1175_p6, %p1482_p9  ;;  %p1183_p1 = scmp.lt.s32.totalorder %s1181_s7, %s1174_s24 }
  0x2a   : > { %p1178_p10 = pneg %p1177_p8  ;;  %p1184_p12 = por %p1183_p1, %p1182_p3 }
  0x2c   : > { %p1185_p13 = pnand %p1184_p12, %p1178_p10 }
  0x2e   : > { %1188 = shalt.err (!%p1185_p13)
}
  0x2f   : > { %s2001_s10 = smov 128   ;;  %s2003_s12 = smov 8  }
  0x30   : > { %1067 = dma.hbm_to_vmem [thread:$0]  (!%p1469_p7), %s1467_s5, 256, %s1474_s8, %s1476_s9, %s2001_s10, %s2001_s10, %s2003_s12  }
  0x31   : > { %s1510_s13 = sadd.s32 4294967295, %s1367_s20   ;;  %s892_s14 = sadd.s32 4294967294, %s1367_s20  }
  0x32   : > { %p79_p1 = scmp.ne.s32.totalorder %s1351_s16, %s1347_s15  ;;  %p2007_p3 = scmp.eq.s32.totalorder %s1510_s13, 0 }
  0x33   : > { %p161_p11 = scmp.eq.s32.totalorder %s1510_s13, 1  ;;  %p167_p0 = scmp.eq.s32.totalorder %s892_s14, 1 }
  0x34   : > { %p893_p2 = scmp.ge.s32.totalorder %s1367_s20, 1  ;;  %p1520_p4 = por %p2007_p3, %p79_p1 }
  0x35   : > { %p2035_p5 = scmp.ne.s32.totalorder %s1355_s17, %s1351_s16  ;;  %p1531_p8 = por %p167_p0, %p79_p1 }
  0x36   : > { %s2034_s22 = scalar_select %p1520_p4, 1, 0 }
  0x37   : > { %p1527_p6 = por %p161_p11, %p2035_p5  ;;  %p174_p10 = scmp.lt.s32.totalorder %s1367_s20, 3 }
  0x38   : > { %s2037_s8 = scalar_select %p1531_p8, 1, 0 }
  0x39   : > { %s2036_s5 = scalar_select %p1527_p6, 1, 0 }
  0x3a   : > { %2038 = sst [smem:[#allocation19_spill]] %s2037_s8  ;;  %p1536_p12 = pnand %p893_p2, %p174_p10 }
  0x3b   : > { %s1372_s24 = smov [#allocation2]   ;;  %s1548_s14 = scalar_lea.hbm %s1996_s2, %s1454_s26 }
  0x3c   : > { %s2039_s23 = scalar_select %p1536_p12, 1, 0 }
  0x3d   : > { %s186_s29 = sshll.u32 %s1372_s24, 4  ;;  %p1060_p13 = pneg %p1536_p12  ;;  %s1540_s29 = int_to_ptr.vmem [resolvable:$true] %s186_s29 }
  0x3e   : > { %s227_s10 = scalar_lea.vmem [#allocation7], %s1461_s28  ;;  %s1189_s21 = scalar_lea.hbm %s1994_s0, 8192 }
  0x3f   : > { %p1552_p1 = pnand %p1060_p13, %p2007_p3  ;;  %s236_s12 = sshll.u32 %s227_s10, 4  ;;  %s1557_s12 = int_to_ptr.vmem [resolvable:$true] %s236_s12 }
  0x40   : > { %p1190_p11 = scmp.ne.s32.totalorder %s1994_s0, %s1189_s21  ;;  %p1196_p10 = scmp.lt.u32.totalorder %s1189_s21, %s1994_s0 }
  0x41   : > { %p1191_p0 = pneg %p1552_p1 }
  0x43   : > { %p1192_p2 = pnand %p1191_p0, %p1190_p11 }
  0x45   : > { %p1193_p5 = pneg %p1192_p2 }
  0x47   : > { %p1198_p13 = pnand %p1196_p10, %p1193_p5 }
  0x49   : > { %1201 = shalt.err (!%p1198_p13)
}
  0x4a   : > { %s1202_s10 = scalar_lea.vmem %s1540_s29, 8192  ;;  %p1210_p4 = scmp.lt.s32.totalorder %s1540_s29, %s1540_s29 }
  0x4b   : > { %p1203_p3 = scmp.ne.s32.totalorder %s1540_s29, %s1202_s10  ;;  %p1211_p12 = scmp.lt.s32.totalorder %s1202_s10, %s1202_s10 }
  0x4d   : > { %p1205_p8 = pnand %p1203_p3, %p1191_p0  ;;  %p1212_p7 = por %p1211_p12, %p1210_p4 }
  0x4f   : > { %p1206_p6 = pneg %p1205_p8 }
  0x51   : > { %p1213_p9 = pnand %p1212_p7, %p1206_p6 }
  0x53   : > { %1216 = shalt.err (!%p1213_p9)
}
  0x54   : > { %s1373_s1 = smov 256   ;;  %s1374_s19 = smov 16  }
  0x55   : > { %1063 = dma.hbm_to_vmem [thread:$0]  (!%p1552_p1), %s1994_s0, 8192, %s1540_s29, [#allocation3], %s1373_s1, %s1373_s1, %s1374_s19  }
  0x56   : > { %s1217_s24 = scalar_lea.hbm %s1548_s14, 256  ;;  %p2041_p8 = scmp.ne.s32.totalorder %s2033_s11, 0 }
  0x57   : > { %p1218_p3 = scmp.ne.s32.totalorder %s1548_s14, %s1217_s24  ;;  %s1222_s10 = scalar_lea.hbm %s1996_s2, 512 }
  0x58   : > { %p1223_p9 = scmp.lt.u32.totalorder %s1548_s14, %s1996_s2  ;;  %p1224_p6 = scmp.lt.u32.totalorder %s1222_s10, %s1217_s24 }
  0x59   : > { %p1220_p4 = pnand %p1218_p3, %p2041_p8  ;;  %p1226_p11 = scmp.lt.u32.totalorder %s1217_s24, %s1548_s14 }
  0x5a   : > { %p1225_p12 = por %p1224_p6, %p1223_p9 }
  0x5b   : > { %p1221_p7 = pneg %p1220_p4 }
  0x5c   : > { %p1227_p0 = por %p1226_p11, %p1225_p12 }
  0x5e   : > { %p1228_p2 = pnand %p1227_p0, %p1221_p7 }
  0x60   : > { %1231 = shalt.err (!%p1228_p2)
}
  0x61   : > { %s1232_s25 = scalar_lea.vmem %s1557_s12, 256  ;;  %s1375_s29 = smov [#allocation7]  }
  0x62   : > { %p1233_p1 = scmp.ne.s32.totalorder %s1557_s12, %s1232_s25  ;;  %s1237_s1 = sshll.u32 %s1375_s29, 4  ;;  %s1238_s1 = int_to_ptr.vmem [resolvable:$false] %s1237_s1 }
  0x63   : > { %s1239_s20 = scalar_lea.vmem %s1238_s1, 512  ;;  %p1240_p13 = scmp.lt.s32.totalorder %s1557_s12, %s1238_s1 }
  0x64   : > { %p1235_p5 = pnand %p1233_p1, %p2041_p8  ;;  %p1241_p3 = scmp.lt.s32.totalorder %s1239_s20, %s1232_s25 }
  0x66   : > { %p1236_p10 = pneg %p1235_p5  ;;  %p1242_p4 = por %p1241_p3, %p1240_p13 }
  0x68   : > { %p1243_p9 = pnand %p1242_p4, %p1236_p10 }
  0x6a   : > { %1246 = shalt.err (!%p1243_p9)
}
  0x6b   : > { %p2042_p7 = scmp.ne.s32.totalorder %s2032_s6, 0  ;;  %s2043_s8 = smov 8  }
  0x6c   : > { %s2044_s19 = smov 128   ;;  %s1609_s24 = scalar_lea.hbm %s1997_s3, %s1454_s26 }
  0x6d   : > { %1070 = dma.hbm_to_vmem [thread:$0]  (!%p2042_p7), %s1548_s14, 256, %s1557_s12, %s1476_s9, %s2044_s19, %s2044_s19, %s2043_s8  }
  0x6e   : > { %s250_s30 = scalar_lea.vmem [#allocation8], %s1461_s28  ;;  %s2045_s10 = sand.u32 1, %s1355_s17  }
  0x6f   : > { %s259_s7 = sshll.u32 %s250_s30, 4  ;;  %s1616_s25 = scalar_lea.sflag [#allocation9], %s2045_s10  ;;  %s1612_s7 = int_to_ptr.vmem [resolvable:$true] %s259_s7 }
  0x70   : > { %s1247_s29 = scalar_lea.hbm %s1609_s24, 256  ;;  %s1252_s26 = scalar_lea.hbm %s1997_s3, 512 }
  0x71   : > { %p1248_p6 = scmp.ne.s32.totalorder %s1609_s24, %s1247_s29  ;;  %p1253_p0 = scmp.lt.u32.totalorder %s1609_s24, %s1997_s3 }
  0x72   : > { %p1254_p2 = scmp.lt.u32.totalorder %s1252_s26, %s1247_s29  ;;  %p1256_p5 = scmp.lt.u32.totalorder %s1247_s29, %s1609_s24 }
  0x73   : > { %p1250_p12 = pnand %p1248_p6, %p2041_p8 }
  0x74   : > { %p1255_p1 = por %p1254_p2, %p1253_p0 }
  0x75   : > { %p1251_p11 = pneg %p1250_p12 }
  0x76   : > { %p1257_p10 = por %p1256_p5, %p1255_p1 }
  0x78   : > { %p1258_p13 = pnand %p1257_p10, %p1251_p11 }
  0x7a   : > { %1261 = shalt.err (!%p1258_p13)
}
  0x7b   : > { %s1262_s28 = scalar_lea.vmem %s1612_s7, 256  ;;  %s1376_s20 = smov [#allocation8]  }
  0x7c   : > { %p1263_p3 = scmp.ne.s32.totalorder %s1612_s7, %s1262_s28  ;;  %s1267_s21 = sshll.u32 %s1376_s20, 4  ;;  %s1268_s21 = int_to_ptr.vmem [resolvable:$false] %s1267_s21 }
  0x7d   : > { %s1269_s27 = scalar_lea.vmem %s1268_s21, 512  ;;  %p1270_p6 = scmp.lt.s32.totalorder %s1612_s7, %s1268_s21 }
  0x7e   : > { %p1265_p4 = pnand %p1263_p3, %p2041_p8  ;;  %p1271_p12 = scmp.lt.s32.totalorder %s1269_s27, %s1262_s28 }
  0x80   : > { %p1266_p9 = pneg %p1265_p4  ;;  %p1272_p0 = por %p1271_p12, %p1270_p6 }
  0x82   : > { %p1273_p2 = pnand %p1272_p0, %p1266_p9 }
  0x84   : > { %1276 = shalt.err (!%p1273_p2)
}
  0x85   : > { %1073 = dma.hbm_to_vmem [thread:$0]  (!%p2042_p7), %s1609_s24, 256, %s1612_s7, %s1616_s25, %s2044_s19, %s2044_s19, %s2043_s8  }
  0x86   : > { %p2046_p8 = scmp.ne.s32.totalorder %s2039_s23, 0 }
  0x87   : > { %p2047_p11 = scmp.eq.s32.totalorder (!%p2046_p8), %s1510_s13, 0 }
  0x88   : > { %271 = sbr.rel (%p2046_p8) target bundleno = 646 (0x286), region = 36 }
  0x8f   : > { %1330 = dma.done.wait (%p2047_p11), [#allocation3], 8192   ;;  %p2048_p1 = pmov %p2047_p11 }
  0x90   : > { %s277_s6 = sand.u32 1, %s1510_s13   ;;  %s1651_s11 = sand.u32 1, %s1351_s16  }
  0x91   : > { %1332 = vsyncadd (%p2048_p1), [#allocation3], 4294959104  ;;  %s1654_s30 = sshll.u32 %s1651_s11, 4  ;;  %s278_s8 = scalar_lea.sflag [#allocation6], %s277_s6 }
  0x92   : > { %s281_s19 = scalar_lea.vmem [#allocation5], %s1654_s30  ;;  %p2049_p7 = scmp.ne.s32.totalorder %s2034_s22, 0 }
  0x94   : > { %1334 = dma.done.wait (%p2049_p7), %s278_s8, 512  }
  0x95   : > { %1336 = vsyncadd (%p2049_p7), %s278_s8, 4294966784  ;;  %s290_s23 = scalar_lea.vmem [#allocation7], %s1654_s30  ;;  %s296_s24 = scalar_lea.sflag [#allocation9], %s1651_s11 }
  0x96   : > { %s299_s13 = scalar_lea.vmem [#allocation8], %s1654_s30 }
  0x97   : > { %1338 = dma.done.wait (%p2049_p7), %s296_s24, 256  }
  0x98   : > { %1340 = vsyncadd (%p2049_p7), %s296_s24, 4294967040  ;;  %v406_v0 = vlaneseq  ;;  %s1377_s7 = smov 64   ;;  %v1676_v11 = vld [vmem:[%s290_s23] sm:$0xff]  ;;  %v1683_v14 = vld [vmem:[%s290_s23 + $0x8] sm:$0xff]  ;;  %v1378_v16 = vmov 0   ;;  %s910_s22 = sshll.u32 %s1651_s11, 6 }
  0x99   : > { %v1695_v19 = vld [vmem:[%s281_s19] sm:$0xff]  ;;  %v1702_v20 = vld [vmem:[%s281_s19 + $0x8] sm:$0xff]  ;;  %s333_s10 = scalar_lea.vmem [#allocation10], %s910_s22  ;;  %s919_s29 = sshll.u32 %s1359_s18, 10 }
  0x9a   : > { %v407_v1 = vand.u32 127, %v406_v0  ;;  %v413_v2 = vshrl.u32 %v406_v0, 7  ;;  %v343_v21 = vld [vmem:[#allocation2 + $0x8] sm:$0xff]  ;;  %v345_v22 = vld [vmem:[#allocation2 + $0x18] sm:$0xff]  ;;  %v342_v24 = vld [vmem:[#allocation2] sm:$0xff]  ;;  %s743_s25 = sshll.u32 %s333_s10, 4  ;;  %s1945_s26 = scalar_lea.hbm %s1998_s4, %s919_s29  ;;  %s1940_s25 = int_to_ptr.vmem [resolvable:$true] %s743_s25 }
  0x9b   : > { %v920_v23 = vpack.c.bf16 %v345_v22, %v343_v21  ;;  %v344_v25 = vld [vmem:[#allocation2 + $0x10] sm:$0xff]  ;;  %v347_v27 = vld [vmem:[#allocation2 + $0x28] sm:$0xff]  ;;  %v349_v28 = vld [vmem:[#allocation2 + $0x38] sm:$0xff]  ;;  %s727_s18 = scalar_lea.sflag [#allocation4], %s1651_s11  ;;  %s1277_s14 = scalar_lea.vmem %s1940_s25, 1024 }
  0x9c   : > { %v408_v3 = vshra.s32 %v407_v1, 3  ;;  %v409_v4 = vand.u32 7, %v407_v1  ;;  %v415_v5 = vand.u32 3, %v413_v2  ;;  %v414_v6 = vadd.s32 8, %v413_v2  ;;  %v346_v30 = vld [vmem:[#allocation2 + $0x20] sm:$0xff]  ;;  %v348_v31 = vld [vmem:[#allocation2 + $0x30] sm:$0xff]  ;;  %p1278_p5 = scmp.ne.s32.totalorder %s1940_s25, %s1277_s14 }
  0x9d   : > { %v922_v26 = vpack.c.bf16 %v344_v25, %v342_v24  ;;  %921 = vmatprep.subr.bf16.mxu0 %v920_v23  ;;  %985 = vmatprep.subr.bf16.mxu1 %v920_v23  ;;  %v924_v29 = vpack.c.bf16 %v349_v28, %v347_v27  ;;  %v926_v32 = vpack.c.bf16 %v348_v31, %v346_v30  ;;  %v351_v33 = vld [vmem:[#allocation2 + $0x48] sm:$0xff]  ;;  %v353_v34 = vld [vmem:[#allocation2 + $0x58] sm:$0xff]  ;;  %v350_v36 = vld [vmem:[#allocation2 + $0x40] sm:$0xff]  ;;  %p2097_p10 = scmp.ne.s32.totalorder %s2036_s5, 0  ;;  %s1379_s1 = smov [#allocation10]  }
  0x9e   : > { %v1668_v7 = vmul.u32 2, %v408_v3  ;;  %v416_v8 = vand.u32 3, %v414_v6  ;;  %v1670_v9 = vmul.u32 2, %v415_v5  ;;  %v928_v35 = vpack.c.bf16 %v353_v34, %v351_v33  ;;  %v352_v37 = vld [vmem:[#allocation2 + $0x50] sm:$0xff]  ;;  %v355_v38 = vld [vmem:[#allocation2 + $0x68] sm:$0xff]  ;;  %v357_v39 = vld [vmem:[#allocation2 + $0x78] sm:$0xff] }
  0x9f   : > { %v1674_v10 = vmul.u32 2, %v409_v4  ;;  %923 = vmatpush1.bf16.msra.mxu0 %v922_v26  ;;  %987 = vmatpush1.bf16.msra.mxu1 %v922_v26  ;;  %v930_v40 = vpack.c.bf16 %v352_v37, %v350_v36  ;;  %v932_v41 = vpack.c.bf16 %v357_v39, %v355_v38  ;;  %v354_v42 = vld [vmem:[#allocation2 + $0x60] sm:$0xff]  ;;  %v356_v43 = vld [vmem:[#allocation2 + $0x70] sm:$0xff]  ;;  %v359_v44 = vld [vmem:[#allocation2 + $0x88] sm:$0xff]  ;;  %p1279_p13 = pnand %p1278_p5, %p2097_p10  ;;  %s1281_s28 = sshll.u32 %s1379_s1, 4  ;;  %s1282_s28 = int_to_ptr.vmem [resolvable:$false] %s1281_s28 }
  0xa0   : > { %561 = vrot.lane.b32.xlu0 %v1668_v7, %s1377_s7  ;;  %v1678_v12 = vmul.u32 2, %v416_v8  ;;  %v569_v13 = vadd.s32 1, %v1670_v9  ;;  %vm2020_vm0 = vcmp.eq.s32.totalorder %v1676_v11, %v1670_v9  ;;  %925 = vmatprep.subr.bf16.mxu0 %v924_v29  ;;  %v361_v45 = vld [vmem:[#allocation2 + $0x98] sm:$0xff]  ;;  %v934_v46 = vpack.c.bf16 %v356_v43, %v354_v42  ;;  %v358_v48 = vld [vmem:[#allocation2 + $0x80] sm:$0xff]  ;;  %v360_v49 = vld [vmem:[#allocation2 + $0x90] sm:$0xff]  ;;  %s1283_s20 = scalar_lea.vmem %s1282_s28, 2048  ;;  %p1284_p4 = scmp.lt.s32.totalorder %s1940_s25, %s1282_s28 }
  0xa1   : > { %989 = vmatprep.subr.bf16.mxu1 %v924_v29  ;;  %v936_v47 = vpack.c.bf16 %v361_v45, %v359_v44  ;;  %v363_v50 = vld [vmem:[#allocation2 + $0xa8] sm:$0xff]  ;;  %v365_v51 = vld [vmem:[#allocation2 + $0xb8] sm:$0xff]  ;;  %v938_v52 = vpack.c.bf16 %v360_v49, %v358_v48  ;;  %v362_v54 = vld [vmem:[#allocation2 + $0xa0] sm:$0xff]  ;;  %p1280_p3 = pneg %p1279_p13  ;;  %p1285_p9 = scmp.lt.s32.totalorder %s1283_s20, %s1277_s14 }
  0xa2   : > { %v570_v15 = vadd.s32 1, %v1678_v12  ;;  %vm2022_vm1 = vcmp.eq.s32.totalorder %v1683_v14, %v1678_v12  ;;  %vm571_vm2 = vcmp.eq.s32.totalorder %v1676_v11, %v569_v13  ;;  %v940_v53 = vpack.c.bf16 %v365_v51, %v363_v50  ;;  %v364_v55 = vld [vmem:[#allocation2 + $0xb0] sm:$0xff]  ;;  %v367_v56 = vld [vmem:[#allocation2 + $0xc8] sm:$0xff]  ;;  %v369_v57 = vld [vmem:[#allocation2 + $0xd8] sm:$0xff] }
  0xa3   : > { %v579_v17 = vsel %vm571_vm2, 1, %v1378_v16  ;;  %927 = vmatpush1.bf16.msra.mxu0 %v926_v32  ;;  %991 = vmatpush1.bf16.msra.mxu1 %v926_v32  ;;  %v942_v58 = vpack.c.bf16 %v364_v55, %v362_v54  ;;  %v944_v59 = vpack.c.bf16 %v369_v57, %v367_v56  ;;  %v366_v60 = vld [vmem:[#allocation2 + $0xc0] sm:$0xff]  ;;  %v368_v61 = vld [vmem:[#allocation2 + $0xd0] sm:$0xff]  ;;  %v371_v62 = vld [vmem:[#allocation2 + $0xe8] sm:$0xff]  ;;  %p1286_p6 = por %p1285_p9, %p1284_p4 }
  0xa4   : > { %565 = vrot.lane.b32.xlu0 %v1674_v10, %s1377_s7  ;;  %vm572_vm3 = vcmp.eq.s32.totalorder %v1683_v14, %v570_v15  ;;  %581 = vrot.lane.b32.xlu1 %v579_v17, %s1377_s7  ;;  %v373_v63 = vld [vmem:[#allocation2 + $0xf8] sm:$0xff]  ;;  %v946_v0 = vpack.c.bf16 %v368_v61, %v366_v60  ;;  %v370_v2 = vld [vmem:[#allocation2 + $0xe0] sm:$0xff]  ;;  %v372_v3 = vld [vmem:[#allocation2 + $0xf0] sm:$0xff] }
  0xa5   : > { %v580_v18 = vsel %vm572_vm3, 1, %v1378_v16  ;;  %929 = vmatprep.subr.bf16.mxu0 %v928_v35  ;;  %993 = vmatprep.subr.bf16.mxu1 %v928_v35  ;;  %v948_v1 = vpack.c.bf16 %v373_v63, %v371_v62  ;;  %v375_v4 = vld [vmem:[#allocation2 + $0x108] sm:$0xff]  ;;  %v377_v5 = vld [vmem:[#allocation2 + $0x118] sm:$0xff]  ;;  %v950_v6 = vpack.c.bf16 %v372_v3, %v370_v2  ;;  %v374_v13 = vld [vmem:[#allocation2 + $0x100] sm:$0xff]  ;;  %p1287_p12 = pnand %p1286_p6, %p1280_p3 }
  0xa6   : > { %v952_v8 = vpack.c.bf16 %v377_v5, %v375_v4  ;;  %v376_v15 = vld [vmem:[#allocation2 + $0x110] sm:$0xff]  ;;  %v379_v16 = vld [vmem:[#allocation2 + $0x128] sm:$0xff]  ;;  %v381_v17 = vld [vmem:[#allocation2 + $0x138] sm:$0xff] }
  0xa7   : > { %931 = vmatpush1.bf16.msra.mxu0 %v930_v40  ;;  %995 = vmatpush1.bf16.msra.mxu1 %v930_v40  ;;  %v956_v21 = vpack.c.bf16 %v381_v17, %v379_v16  ;;  %v378_v22 = vld [vmem:[#allocation2 + $0x120] sm:$0xff]  ;;  %v380_v23 = vld [vmem:[#allocation2 + $0x130] sm:$0xff]  ;;  %v383_v24 = vld [vmem:[#allocation2 + $0x148] sm:$0xff]  ;;  %v2058_v16 = vmov 0 }
  0xa8   : > { %583 = vrot.lane.b32.xlu0 %v580_v18, %s1377_s7  ;;  %591 = vrot.lane.b32.xlu1 %v1695_v19, %s1377_s7  ;;  %v954_v18 = vpack.c.bf16 %v376_v15, %v374_v13  ;;  %v385_v25 = vld [vmem:[#allocation2 + $0x158] sm:$0xff]  ;;  %v958_v26 = vpack.c.bf16 %v380_v23, %v378_v22  ;;  %v382_v28 = vld [vmem:[#allocation2 + $0x140] sm:$0xff]  ;;  %v384_v29 = vld [vmem:[#allocation2 + $0x150] sm:$0xff] }
  0xa9   : > { %933 = vmatprep.subr.bf16.mxu0 %v932_v41  ;;  %997 = vmatprep.subr.bf16.mxu1 %v932_v41  ;;  %v960_v27 = vpack.c.bf16 %v385_v25, %v383_v24  ;;  %v387_v30 = vld [vmem:[#allocation2 + $0x168] sm:$0xff]  ;;  %v389_v31 = vld [vmem:[#allocation2 + $0x178] sm:$0xff]  ;;  %v962_v32 = vpack.c.bf16 %v384_v29, %v382_v28  ;;  %v386_v34 = vld [vmem:[#allocation2 + $0x160] sm:$0xff] }
  0xaa   : > { %v964_v33 = vpack.c.bf16 %v389_v31, %v387_v30  ;;  %v388_v35 = vld [vmem:[#allocation2 + $0x170] sm:$0xff]  ;;  %v391_v36 = vld [vmem:[#allocation2 + $0x188] sm:$0xff]  ;;  %v393_v37 = vld [vmem:[#allocation2 + $0x198] sm:$0xff] }
  0xab   : > { %935 = vmatpush1.bf16.msra.mxu0 %v934_v46  ;;  %999 = vmatpush1.bf16.msra.mxu1 %v934_v46  ;;  %v966_v38 = vpack.c.bf16 %v388_v35, %v386_v34  ;;  %v968_v39 = vpack.c.bf16 %v393_v37, %v391_v36  ;;  %v390_v40 = vld [vmem:[#allocation2 + $0x180] sm:$0xff]  ;;  %v392_v41 = vld [vmem:[#allocation2 + $0x190] sm:$0xff]  ;;  %v395_v42 = vld [vmem:[#allocation2 + $0x1a8] sm:$0xff] }
  0xac   : > { %593 = vrot.lane.b32.xlu1 %v1702_v20, %s1377_s7  ;;  %937 = vmatprep.subr.bf16.mxu0 %v936_v47  ;;  %v397_v43 = vld [vmem:[#allocation2 + $0x1b8] sm:$0xff]  ;;  %v970_v44 = vpack.c.bf16 %v392_v41, %v390_v40  ;;  %v394_v46 = vld [vmem:[#allocation2 + $0x1a0] sm:$0xff]  ;;  %v399_v48 = vld [vmem:[#allocation2 + $0x1c8] sm:$0xff] }
  0xad   : > { %1001 = vmatprep.subr.bf16.mxu1 %v936_v47  ;;  %v972_v45 = vpack.c.bf16 %v397_v43, %v395_v42  ;;  %v396_v47 = vld [vmem:[#allocation2 + $0x1b0] sm:$0xff]  ;;  %v401_v49 = vld [vmem:[#allocation2 + $0x1d8] sm:$0xff]  ;;  %v403_v17 = vld [vmem:[#allocation2 + $0x1e8] sm:$0xff] }
  0xae   : > { %v974_v50 = vpack.c.bf16 %v396_v47, %v394_v46  ;;  %v976_v51 = vpack.c.bf16 %v401_v49, %v399_v48  ;;  %v340_v55 = vld [vmem:[%s299_s13] sm:$0xff]  ;;  %v341_v57 = vld [vmem:[%s299_s13 + $0x8] sm:$0xff] }
  0xaf   : > { %939 = vmatpush1.bf16.msra.mxu0 %v938_v52  ;;  %1003 = vmatpush1.bf16.msra.mxu1 %v938_v52  ;;  %v398_v52 = vld [vmem:[#allocation2 + $0x1c0] sm:$0xff]  ;;  %v421_v56 = vand.u32 15, %v340_v55  ;;  %v422_v61 = vand.u32 15, %v341_v57  ;;  %v404_v24 = vld [vmem:[#allocation2 + $0x1f0] sm:$0xff] }
  0xb0   : > { %941 = vmatprep.subr.bf16.mxu0 %v940_v53  ;;  %1005 = vmatprep.subr.bf16.mxu1 %v940_v53  ;;  %v400_v53 = vld [vmem:[#allocation2 + $0x1d0] sm:$0xff]  ;;  %v402_v23 = vld [vmem:[#allocation2 + $0x1e0] sm:$0xff] }
  0xb1   : > { %v978_v54 = vpack.c.bf16 %v400_v53, %v398_v52  ;;  %v1714_v62 = vsub.s32 %v421_v56, %v1674_v10 }
  0xb3   : > { %943 = vmatpush1.bf16.msra.mxu0 %v942_v58  ;;  %1007 = vmatpush1.bf16.msra.mxu1 %v942_v58  ;;  %v419_v58 = vshra.s32 %v340_v55, 4  ;;  %vm441_vm5 = vcmp.eq.s32.totalorder %v1714_v62, 1 }
  0xb4   : > { %945 = vmatprep.subr.bf16.mxu0 %v944_v59  ;;  %1009 = vmatprep.subr.bf16.mxu1 %v944_v59  ;;  %v420_v59 = vshra.s32 %v341_v57, 4 }
  0xb5   : > { %v1711_v60 = vsub.s32 %v419_v58, %v1668_v7 }
  0xb6   : > { %v1717_v63 = vsub.s32 %v420_v59, %v1668_v7 }
  0xb7   : > { %947 = vmatpush1.bf16.msra.mxu0 %v946_v0  ;;  %1011 = vmatpush1.bf16.msra.mxu1 %v946_v0  ;;  %v1720_v0 = vsub.s32 %v422_v61, %v1674_v10  ;;  %vm2021_vm4 = vcmp.eq.s32.totalorder %v1711_v60, 1  ;;  %vm2023_vm6 = vcmp.eq.s32.totalorder %v1711_v60, 0 }
  0xb8   : > { %949 = vmatprep.subr.bf16.mxu0 %v948_v1  ;;  %1013 = vmatprep.subr.bf16.mxu1 %v948_v1  ;;  %vm2018_vm7 = vcmp.eq.s32.totalorder %v1717_v63, 0  ;;  %vm2019_vm9 = vcmp.eq.s32.totalorder %v1717_v63, 1  ;;  %vm457_vm10 = vmand %vm2021_vm4, %vm441_vm5 }
  0xb9   : > { %vm442_vm8 = vcmp.eq.s32.totalorder %v1720_v0, 1  ;;  %vm443_vm11 = vmand %vm2023_vm6, %vm441_vm5 }
  0xba   : > { %vm444_vm12 = vmand %vm2018_vm7, %vm442_vm8 }
  0xbb   : > { %951 = vmatpush1.bf16.msra.mxu0 %v950_v6  ;;  %1015 = vmatpush1.bf16.msra.mxu1 %v950_v6  ;;  %vm1739_vm13 = vmand %vm457_vm10, %vm2020_vm0 }
  0xbc   : > { %953 = vmatprep.subr.bf16.mxu0 %v952_v8  ;;  %1017 = vmatprep.subr.bf16.mxu1 %v952_v8  ;;  %vm458_vm14 = vmand %vm2019_vm9, %vm442_vm8  ;;  %v461_v35 = vsel %vm1739_vm13, %v1695_v19, 0.0 }
  0xbd   : > { %vm1748_vm15 = vmand %vm443_vm11, %vm2020_vm0 }
  0xbe   : > { %vm1756_vm10 = vmand %vm444_vm12, %vm2022_vm1 }
  0xbf   : > { %955 = vmatpush1.bf16.msra.mxu0 %v954_v18  ;;  %1019 = vmatpush1.bf16.msra.mxu1 %v954_v18  ;;  %vm1770_vm0 = vmand %vm458_vm14, %vm2022_vm1  ;;  %v405_v18 = vld [vmem:[#allocation2 + $0x1f8] sm:$0xff] }
  0xc0   : > { %957 = vmatprep.subr.bf16.mxu0 %v956_v21  ;;  %1021 = vmatprep.subr.bf16.mxu1 %v956_v21  ;;  %v2059_v16 = vsel %vm1770_vm0, 4294967295, %v2058_v16  ;;  %v980_v22 = vpack.c.bf16 %v405_v18, %v403_v17 }
  0xc1   : > { %vm2074_vm13 = vnez %v2059_v16 }
  0xc2   : > { %v462_v43 = vsel %vm2074_vm13, %v1702_v20, 0.0  ;;  %vm2086_vm13 = vcmp.eq.s32.totalorder %v1717_v63, 0 }
  0xc3   : > { %959 = vmatpush1.bf16.msra.mxu0 %v958_v26  ;;  %1023 = vmatpush1.bf16.msra.mxu1 %v958_v26 }
  0xc4   : > { %961 = vmatprep.subr.bf16.mxu0 %v960_v27  ;;  %1025 = vmatprep.subr.bf16.mxu1 %v960_v27  ;;  %v982_v27 = vpack.c.bf16 %v404_v24, %v402_v23 }
  0xc7   : > { %963 = vmatpush1.bf16.msra.mxu0 %v962_v32  ;;  %1027 = vmatpush1.bf16.msra.mxu1 %v962_v32  ;;  %v447_v32 = vsel %vm1748_vm15, %v1695_v19, 0.0 }
  0xc8   : > { %965 = vmatprep.subr.bf16.mxu0 %v964_v33  ;;  %1029 = vmatprep.subr.bf16.mxu1 %v964_v33 }
  0xcb   : > { %967 = vmatpush1.bf16.msra.mxu0 %v966_v38  ;;  %1031 = vmatpush1.bf16.msra.mxu1 %v966_v38  ;;  %v448_v38 = vsel %vm1756_vm10, %v1702_v20, 0.0 }
  0xcc   : > { %969 = vmatprep.subr.bf16.mxu0 %v968_v39  ;;  %1033 = vmatprep.subr.bf16.mxu1 %v968_v39 }
  0xcf   : > { %971 = vmatpush1.bf16.msra.mxu0 %v970_v44  ;;  %1035 = vmatpush1.bf16.msra.mxu1 %v970_v44 }
  0xd0   : > { %973 = vmatprep.subr.bf16.mxu0 %v972_v45  ;;  %1037 = vmatprep.subr.bf16.mxu1 %v972_v45 }
  0xd3   : > { %975 = vmatpush1.bf16.msra.mxu0 %v974_v50  ;;  %1039 = vmatpush1.bf16.msra.mxu1 %v974_v50 }
  0xd4   : > { %977 = vmatprep.subr.bf16.mxu0 %v976_v51  ;;  %1041 = vmatprep.subr.bf16.mxu1 %v976_v51 }
  0xd7   : > { %979 = vmatpush1.bf16.msra.mxu0 %v978_v54  ;;  %1043 = vmatpush1.bf16.msra.mxu1 %v978_v54 }
  0xd8   : > { %981 = vmatprep.subr.bf16.mxu0 %v980_v22  ;;  %1045 = vmatprep.subr.bf16.mxu1 %v980_v22 }
  0xdb   : > { %983 = vmatpush1.bf16.msra.mxu0 %v982_v27  ;;  %1047 = vmatpush1.bf16.msra.mxu1 %v982_v27 }
 0x112   : > { %v562_v1 = vpop.permute.xlu0 %561 }
 0x113   : > { %v1730_v7 = vsub.s32 %v419_v58, %v562_v1  ;;  %v564_v10 = vsub.s32 %v420_v59, %v562_v1 }
 0x115   : > { %vm573_vm2 = vcmp.eq.s32.totalorder %v1730_v7, 0  ;;  %vm574_vm8 = vcmp.eq.s32.totalorder %v564_v10, 0  ;;  %vm2025_vm14 = vcmp.eq.s32.totalorder %v1730_v7, 1  ;;  %vm608_vm6 = vcmp.eq.s32.totalorder %v564_v10, 1 }
 0x116   : > { %v566_v2 = vpop.permute.xlu0 %565  ;;  %v582_v5 = vpop.permute.xlu1 %581 }
 0x117   : > { %v567_v3 = vsub.s32 %v421_v56, %v566_v2  ;;  %v568_v4 = vsub.s32 %v422_v61, %v566_v2  ;;  %vm585_vm0 = vcmp.ne.s32.totalorder %v582_v5, 0 }
 0x119   : > { %vm575_vm3 = vcmp.eq.s32.totalorder %v567_v3, 0  ;;  %vm576_vm5 = vcmp.eq.s32.totalorder %v568_v4, 0  ;;  %vm2024_vm7 = vcmp.eq.s32.totalorder %v567_v3, 1  ;;  %vm600_vm9 = vcmp.eq.s32.totalorder %v568_v4, 1 }
 0x11a   : > { %vm1763_vm11 = vmand %vm573_vm2, %vm575_vm3  ;;  %v1786_v26 = vpop.permute.xlu1 %591  ;;  %v584_v29 = vpop.permute.xlu0 %583  ;;  %vm2077_vm10 = vcmp.eq.s32.totalorder %v567_v3, 1 }
 0x11b   : > { %vm1775_vm12 = vmand %vm574_vm8, %vm576_vm5 }
 0x11c   : > { %vm1782_vm4 = vmand %vm573_vm2, %vm2024_vm7 }
 0x11d   : > { %vm1790_vm1 = vmand %vm574_vm8, %vm600_vm9 }
 0x11e   : > { %vm609_vm2 = vmand %vm2025_vm14, %vm575_vm3  ;;  %vm586_vm14 = vcmp.ne.s32.totalorder %v584_v29, 0  ;;  %v1820_v34 = vpop.permute.xlu1 %593 }
 0x11f   : > { %vm1798_vm7 = vmand %vm608_vm6, %vm576_vm5 }
 0x120   : > { %vm1803_vm8 = vmand %vm608_vm6, %vm600_vm9 }
 0x121   : > { %vm587_vm3 = vmand %vm1763_vm11, %vm585_vm0  ;;  %vm2078_vm11 = vcmp.eq.s32.totalorder %v1730_v7, 1 }
 0x122   : > { %vm1816_vm5 = vmand %vm1782_vm4, %vm585_vm0  ;;  %v597_v36 = vsel %vm587_vm3, %v1786_v26, 0.0  ;;  %vm434_vm3 = vcmp.eq.s32.totalorder %v1720_v0, 0 }
 0x123   : > { %vm611_vm6 = vmand %vm609_vm2, %vm585_vm0  ;;  %v1144_v37 = vpack.i.bf16 %v597_v36, %v447_v32  ;;  %v605_v39 = vsel %vm1816_vm5, %v1786_v26, 0.0  ;;  %vm2081_vm2 = vcmp.eq.s32.totalorder %v1711_v60, 0  ;;  %vm2082_vm5 = vcmp.eq.s32.totalorder %v1711_v60, 1 }
 0x124   : > { %vm588_vm4 = vmand %vm1775_vm12, %vm586_vm14  ;;  %v613_v40 = vsel %vm611_vm6, %v1786_v26, 0.0 }
 0x125   : > { %vm1840_vm9 = vmand %vm1790_vm1, %vm586_vm14  ;;  %v1139_v42 = vpack.i.bf16 %v613_v40, %v461_v35  ;;  %1145 = vrot.lane.b32.xlu1 %v1144_v37, %s1377_s7  ;;  %v598_v44 = vsel %vm588_vm4, %v1820_v34, 0.0 }
 0x126   : > { %vm612_vm15 = vmand %vm1798_vm7, %vm586_vm14  ;;  %v1154_v45 = vpack.i.bf16 %v598_v44, %v448_v38  ;;  %v606_v4 = vsel %vm1840_vm9, %v1820_v34, 0.0 }
 0x127   : > { %vm1855_vm1 = vmand %vm1803_vm8, %vm586_vm14  ;;  %1140 = vrot.lane.b32.xlu0 %v1139_v42, %s1377_s7  ;;  %v614_v47 = vsel %vm612_vm15, %v1820_v34, 0.0  ;;  %vm433_vm14 = vcmp.eq.s32.totalorder %v1714_v62, 0 }
 0x128   : > { %v1149_v48 = vpack.i.bf16 %v614_v47, %v462_v43  ;;  %vm615_vm12 = vmand %vm2078_vm11, %vm2077_vm10  ;;  %v620_v5 = vsel %vm1855_vm1, %v1820_v34, 0.0 }
 0x129   : > { %1155 = vrot.lane.b32.xlu1 %v1154_v45, %s1377_s7  ;;  %vm1867_vm7 = vmand %vm615_vm12, %vm585_vm0  ;;  %vm2083_vm0 = vcmp.eq.s32.totalorder %v1676_v11, %v1670_v9  ;;  %vm2090_vm12 = vcmp.eq.s32.totalorder %v1717_v63, 1 }
 0x12a   : > { %v619_v50 = vsel %vm1867_vm7, %v1786_v26, 0.0  ;;  %vm435_vm8 = vmand %vm2081_vm2, %vm433_vm14  ;;  %vm2091_vm2 = vcmp.eq.s32.totalorder %v1683_v14, %v1678_v12 }
 0x12b   : > { %1150 = vrot.lane.b32.xlu0 %v1149_v48, %s1377_s7  ;;  %vm451_vm6 = vmand %vm2082_vm5, %vm433_vm14  ;;  %vm479_vm14 = vcmask 523264  }
 0x12c   : > { %vm1883_vm4 = vmand %vm435_vm8, %vm2083_vm0 }
 0x12d   : > { %vm436_vm15 = vmand %vm2086_vm13, %vm434_vm3  ;;  %v439_v56 = vsel %vm1883_vm4, %v1695_v19, 0.0 }
 0x12e   : > { %vm2087_vm10 = vmmov %vm2083_vm0 }
 0x12f   : > { %vm1892_vm11 = vmand %vm451_vm6, %vm2087_vm10 }
 0x130   : > { %vm452_vm7 = vmand %vm2090_vm12, %vm434_vm3  ;;  %v455_v57 = vsel %vm1892_vm11, %v1695_v19, 0.0 }
 0x131   : > { %vm1904_vm8 = vmand %vm436_vm15, %vm2091_vm2 }
 0x132   : > { %vm2094_vm3 = vmmov %vm2091_vm2  ;;  %v440_v0 = vsel %vm1904_vm8, %v1702_v20, 0.0 }
 0x133   : > { %vm1914_vm5 = vmand %vm452_vm7, %vm2094_vm3 }
 0x134   : > { %v456_v14 = vsel %vm1914_vm5, %v1702_v20, 0.0 }
 0x197   : > { %v1146_v53 = vpop.permute.xlu1 %1145 }
 0x198   : > { %v1148_v54 = vunpack.i.h.bf16 %v1146_v53  ;;  %v1147_v55 = vunpack.i.l.bf16 %v1146_v53 }
 0x199   : > { %v1141_v11 = vpop.permute.xlu0 %1140 }
 0x19a   : > { %v1143_v58 = vunpack.i.h.bf16 %v1141_v11  ;;  %v1142_v59 = vunpack.i.l.bf16 %v1141_v11  ;;  %v480_v62 = vsel %vm479_vm14, %v439_v56, %v1147_v55  ;;  %v637_v63 = vsel %vm479_vm14, %v1148_v54, %v605_v39 }
 0x19b   : > { %v1156_v61 = vpop.permute.xlu1 %1155 }
 0x19c   : > { %v482_v19 = vsel %vm479_vm14, %v455_v57, %v1142_v59  ;;  %v639_v1 = vsel %vm479_vm14, %v1143_v58, %v619_v50  ;;  %v1158_v7 = vunpack.i.h.bf16 %v1156_v61  ;;  %v1157_v10 = vunpack.i.l.bf16 %v1156_v61 }
 0x19d   : > { %v1151_v12 = vpop.permute.xlu0 %1150  ;;  %548 = vmatprep.mubr.f32.mxu0 %v482_v19  ;;  %705 = vmatprep.mubr.f32.mxu1 %v639_v1 }
 0x19e   : > { %v1153_v2 = vunpack.i.h.bf16 %v1151_v12  ;;  %v1152_v3 = vunpack.i.l.bf16 %v1151_v12  ;;  %549 = vmatmul.mubr.f32.vlgmr.msra.gmra.mrb[0].mxu0 %v480_v62  ;;  %706 = vmatmul.mubr.f32.vlgmr.msra.gmra.mrb[0].mxu1 %v637_v63  ;;  %v481_v6 = vsel %vm479_vm14, %v440_v0, %v1157_v10  ;;  %v638_v8 = vsel %vm479_vm14, %v1158_v7, %v606_v4 }
 0x1a0   : > { %v483_v13 = vsel %vm479_vm14, %v456_v14, %v1152_v3  ;;  %v640_v20 = vsel %vm479_vm14, %v1153_v2, %v620_v5 }
 0x1a1   : > { %554 = vmatprep.mubr.f32.mxu0 %v483_v13  ;;  %711 = vmatprep.mubr.f32.mxu1 %v640_v20 }
 0x1a2   : > { %555 = vmatmul.mubr.f32.gmra.mrb[2].mxu0 %v481_v6  ;;  %712 = vmatmul.mubr.f32.gmra.mrb[2].mxu1 %v638_v8 }
 0x271   : > { %v550_v15 = vpop.f32.mrb[0].mxu0  ;;  %v707_v16 = vpop.f32.mrb[0].mxu1 }
 0x272   : > { %718 = vst [vmem:[%s333_s10] sm:$0xff] %v550_v15  ;;  %720 = vst [vmem:[%s333_s10 + $0x10] sm:$0xff] %v707_v16  ;;  %v552_v17 = vpop.f32.mrb[1].mxu0  ;;  %v709_v18 = vpop.f32.mrb[1].mxu1 }
 0x273   : > { %719 = vst [vmem:[%s333_s10 + $0x8] sm:$0xff] %v552_v17  ;;  %721 = vst [vmem:[%s333_s10 + $0x18] sm:$0xff] %v709_v18 }
 0x275   : > { %v556_v21 = vpop.f32.mrb[2].mxu0  ;;  %v713_v22 = vpop.f32.mrb[2].mxu1 }
 0x276   : > { %722 = vst [vmem:[%s333_s10 + $0x20] sm:$0xff] %v556_v21  ;;  %724 = vst [vmem:[%s333_s10 + $0x30] sm:$0xff] %v713_v22  ;;  %v558_v23 = vpop.f32.mrb[3].mxu0  ;;  %v715_v24 = vpop.f32.mrb[3].mxu1 }
 0x277   : > { %723 = vst [vmem:[%s333_s10 + $0x28] sm:$0xff] %v558_v23  ;;  %725 = vst [vmem:[%s333_s10 + $0x38] sm:$0xff] %v715_v24 }
 0x278   : > { %1290 = shalt.err (!%p1287_p12)
}
 0x279   : > { %s1291_s21 = scalar_lea.hbm %s1945_s26, 1024  ;;  %s1295_s30 = scalar_lea.hbm %s1998_s4, 2048 }
 0x27a   : > { %p1292_p0 = scmp.ne.s32.totalorder %s1945_s26, %s1291_s21  ;;  %p1296_p11 = scmp.lt.u32.totalorder %s1945_s26, %s1998_s4 }
 0x27b   : > { %p1297_p1 = scmp.lt.u32.totalorder %s1295_s30, %s1291_s21  ;;  %p1299_p5 = scmp.lt.u32.totalorder %s1291_s21, %s1945_s26 }
 0x27c   : > { %p1293_p2 = pnand %p1292_p0, %p2097_p10 }
 0x27d   : > { %p1298_p7 = por %p1297_p1, %p1296_p11 }
 0x27e   : > { %p1294_p8 = pneg %p1293_p2 }
 0x27f   : > { %p1300_p13 = por %p1299_p5, %p1298_p7 }
 0x281   : > { %p1301_p3 = pnand %p1300_p13, %p1294_p8 }
 0x283   : > { %1304 = shalt.err (!%p1301_p3)
}
 0x284   : > { %s1380_s23 = smov 512   ;;  %s1381_s24 = smov 32  }
 0x285   : > { %1058 = dma.vmem_to_hbm [thread:$0]  (%p2097_p10), %s1940_s25, 1024, %s1945_s26, %s727_s18, %s1380_s23, %s1380_s23, %s1381_s24  }
 0x286 PF: > { %s2098_s13 = sld [smem:[#allocation19_spill]]  ;;  %s2099_s7 = sld [smem:[#allocation16_spill]] }
 0x287   : > { %s758_s22 = sand.u32 1, %s1347_s15  }
 0x288   : > { %s759_s10 = scalar_lea.sflag [#allocation4], %s758_s22 }
 0x28c   : > { %p2100_p4 = scmp.ne.s32.totalorder %s2098_s13, 0  ;;  %p2101_p9 = scmp.ge.s32.totalorder %s2099_s7, 2 }
 0x28e   : > { %p1075_p6 = pnand %p2101_p9, %p2100_p4 }
 0x290   : > { %1342 = dma.done.wait (!%p1075_p6), %s759_s10, 1024  }
 0x291   : > { %1344 = vsyncadd (!%p1075_p6), %s759_s10, 4294966272  ;;  %s24_s20 = sadd.s32 1, %s2099_s7   ;;  %s2102_s29 = sld [smem:[#allocation18_spill]] }
 0x292   : > { %p21_p12 = scmp.ge.s32.totalorder %s24_s20, 4   ;;  %s2103_s18 = sld [smem:[#allocation15_spill]] }
 0x293   : > { %s2104_s19 = sld [smem:[#allocation17_spill]]  ;;  %s2105_s15 = smov %s1351_s16 }
 0x294   : > { %s2106_s16 = smov %s1355_s17  ;;  %23 = sbr.rel (!%p21_p12) target bundleno = 11 (0xb), region = 110 }
 0x297   : > { %s2107_s17 = smov %s2102_s29 }
 0x29b   :  { %764 = vsyncpa [#allocation3], 1 }
 0x29c   :  { %766 = vsyncpa [#allocation3 + $0x1], 1 }
 0x29d   :  { %767 = vsyncpa [#allocation6], 1 }
 0x29e   :  { %769 = vsyncpa [#allocation6 + $0x1], 1 }
 0x29f   :  { %770 = vsyncpa [#allocation9], 1 }
 0x2a0   :  { %772 = vsyncpa [#allocation9 + $0x1], 1 }
 0x2a1   :  { %773 = vsyncpa [#allocation4], 1 }
 0x2a2   :  { %775 = vsyncpa [#allocation4 + $0x1], 1 }

</bundles_post_ra>
